<compile_context>
chip_gen: v7x
topology: tpu7x:2x2x1
jax: 0.10.0
libtpu: 0.0.40
codegen_flags: <defaults>
</compile_context>

<pallas_src>
import functools

import jax
import jax.numpy as jnp
from jax.experimental import pallas as pl
from jax.experimental.pallas import tpu as pltpu

# ---- constants implied by the module -------------------------------------
PYRAMID_IDX = 0
BLOCK_IDX = 1
BLUE_IDX = 2
RED_IDX = 3
POINTUP_IDX = 4
POINTDOWN_IDX = 5
PIECE_EMBEDDING_SIZE = 6

PIECES = [".", "a", "A", "v", "V", "b", "B"]
_P2F = {
    ".": [],
    "a": [PYRAMID_IDX, BLUE_IDX, POINTUP_IDX],
    "A": [PYRAMID_IDX, RED_IDX, POINTUP_IDX],
    "v": [PYRAMID_IDX, BLUE_IDX, POINTDOWN_IDX],
    "V": [PYRAMID_IDX, RED_IDX, POINTDOWN_IDX],
    "b": [BLOCK_IDX, BLUE_IDX],
    "B": [BLOCK_IDX, RED_IDX],
}


def build_i2f(pieces):
    """Replicates the registered `_i2f` buffer: (num_pieces, PIECE_EMBEDDING_SIZE)."""
    import numpy as np

    i2f = np.zeros((len(pieces), PIECE_EMBEDDING_SIZE), dtype=np.float32)
    for i, p in enumerate(pieces):
        for j in _P2F[p]:
            i2f[i, j] = 1.0
    return jnp.asarray(i2f)


def _round_up(x, m):
    return ((x + m - 1) // m) * m


# ---- Pallas kernel ---------------------------------------------------------
def bow_lut_kernel(idx_ref, lut_ref, o_ref):
    """VPU gather from a fused lookup table, lane-dense (PACK tokens per row).

    idx_ref: (TR, PACK) int32    PACK token indices per output row
    lut_ref: (P, PACK*E) f32     fused (i2f @ W.T + bias) table, lane-tiled
    o_ref:   (TR, PACK*E) f32    row r = [lut[idx[r,0]] | ... | lut[idx[r,PACK-1]]]
    """
    tr, pack = idx_ref.shape
    num_pieces, width = lut_ref.shape
    e = width // pack

    # Widen the PACK per-row indices across lanes: lanes [k*E, (k+1)*E) carry
    # the k-th token's index.  Pure VPU iota/compare/select, (PACK-1) selects.
    lane = jax.lax.broadcasted_iota(jnp.int32, (tr, width), 1)
    idx_wide = idx_ref[:, 0:1]                          # (TR, 1) -> broadcasts
    for k in range(1, pack):                            # static unroll
        idx_wide = jnp.where(lane >= k * e, idx_ref[:, k : k + 1], idx_wide)

    # Gather via (P-1) compare+selects; the last LUT row is the chain default
    # (no one-hot materialized, no MXU; LUT stays resident in vregs).
    lut = lut_ref[...]                                  # (P, width)
    acc = jnp.broadcast_to(lut[num_pieces - 1 : num_pieces, :], (tr, width))
    for p in range(num_pieces - 1):                     # static unroll (P == 7)
        acc = jnp.where(idx_wide == p, lut[p : p + 1, :], acc)

    o_ref[...] = acc                                    # full-width, unmasked store


# ---- wrapper ---------------------------------------------------------------
@functools.partial(jax.jit, static_argnames=("tile_rows",))
def piece_embedding_bow(x, i2f, weight, bias=None, *, tile_rows=2048):
    """x: (N, B) integer indices -> (N, B, embedding_dim) float32."""
    N, B = x.shape
    E = weight.shape[0]
    P = i2f.shape[0]

    # Pack enough tokens per output row to make it lane-dense (>= 128 lanes).
    pack = max(1, -(-128 // E))
    width = pack * E

    # Fused lookup table: (P, E); tile along lanes -> (P, pack*E).
    lut = i2f.astype(jnp.float32) @ weight.astype(jnp.float32).T
    if bias is not None:
        lut = lut + bias.astype(jnp.float32)[None, :]
    lut_wide = jnp.tile(lut, (1, pack)) if pack > 1 else lut

    # Flatten tokens, pad the token count up to pack * rows_padded.  Indices
    # are 0..P-1 so the int32 cast is lossless; pad value 0 is a valid piece
    # index and padded rows are sliced off below.
    NB = N * B
    idx = x.reshape(NB).astype(jnp.int32)
    rows = -(-NB // pack)                                # ceil(NB / pack)
    tr = min(tile_rows, _round_up(rows, 8))              # sublane-aligned tile
    rows_padded = _round_up(rows, tr)
    pad_tokens = pack * rows_padded - NB
    if pad_tokens:
        idx = jnp.concatenate([idx, jnp.zeros((pad_tokens,), jnp.int32)])
    idx_packed = idx.reshape(rows_padded, pack)

    grid = (rows_padded // tr,)
    out = pl.pallas_call(
        bow_lut_kernel,
        out_shape=jax.ShapeDtypeStruct((rows_padded, width), jnp.float32),
        grid=grid,
        in_specs=[
            pl.BlockSpec((tr, pack), lambda i: (i, 0)),     # token-index tile
            pl.BlockSpec((P, width), lambda i: (0, 0)),     # full LUT, resident
        ],
        out_specs=pl.BlockSpec((tr, width), lambda i: (i, 0)),
        compiler_params=pltpu.CompilerParams(
            dimension_semantics=("parallel",),              # shard across TCs on v7x
        ),
    )(idx_packed, lut_wide)

    # (rows_padded, pack*E) -> (rows_padded*pack, E) -> drop padding -> (N, B, E)
    out = out.reshape(rows_padded * pack, E)[:NB]
    return out.reshape(N, B, E)


if __name__ == "__main__":
    embedding_dim = 64
    N, B = 8, 4  # structure length, batch size

    key = jax.random.PRNGKey(0)
    k_w, k_b, k_x = jax.random.split(key, 3)

    # Deterministic parameter init mirroring reset_parameters (standard normal).
    weight = jax.random.normal(k_w, (embedding_dim, PIECE_EMBEDDING_SIZE), jnp.float32)
    bias = jax.random.normal(k_b, (embedding_dim,), jnp.float32)
    i2f = build_i2f(PIECES)

    # Example input: sequence of piece indices, shape (N, B).
    x = jax.random.randint(k_x, (N, B), 0, len(PIECES), dtype=jnp.int32)

    out = piece_embedding_bow(x, i2f, weight, bias)
    out = jax.block_until_ready(out)

    # Pure-JAX reference check (mirrors the PyTorch forward).
    ref = (i2f[x].reshape(N * B, -1) @ weight.T).reshape(N, B, -1) + bias
    assert out.shape == (N, B, embedding_dim)
    assert jnp.allclose(out, ref, atol=1e-5), "mismatch vs reference"

    print("KERNEL_OK")
</pallas_src>

<mosaic_0001>
module attributes {stable_mosaic.version = 11 : i64} {
  func.func @bow_lut_kernel(%arg0: i32, %arg1: memref<16x2xi32, #tpu.memory_space<vmem>>, %arg2: memref<7x128xf32, #tpu.memory_space<vmem>>, %arg3: memref<16x128xf32, #tpu.memory_space<vmem>>) attributes {dimension_semantics = [#tpu.dimension_semantics<parallel>], iteration_bounds = array<i64: 1>, scalar_prefetch = 0 : i64, scratch_operands = 0 : i64, tpu.core_type = #tpu.core_type<tc>, window_params = [{transform_indices = @transform_0, window_bounds = array<i64: 16, 2>}, {pipeline_mode = #tpu.pipeline_mode<synchronous>, transform_indices = @transform_1, window_bounds = array<i64: 7, 128>}, {transform_indices = @transform_2, window_bounds = array<i64: 16, 128>}]} {
    %0 = tpu.iota {dimensions = array<i32: 1>} : vector<16x128xi32>
    %c0 = arith.constant 0 : index
    %c0_0 = arith.constant 0 : index
    %1 = vector.load %arg1[%c0, %c0_0] : memref<16x2xi32, #tpu.memory_space<vmem>>, vector<16x1xi32>
    %c64_i32 = arith.constant 64 : i32
    %2 = vector.broadcast %c64_i32 : i32 to vector<16x128xi32>
    %3 = arith.cmpi sge, %0, %2 : vector<16x128xi32>
    %c0_1 = arith.constant 0 : index
    %c1 = arith.constant 1 : index
    %4 = vector.load %arg1[%c0_1, %c1] : memref<16x2xi32, #tpu.memory_space<vmem>>, vector<16x1xi32>
    %5 = vector.shape_cast %4 : vector<16x1xi32> to vector<16x1xi32>
    %6 = vector.broadcast %5 : vector<16x1xi32> to vector<16x128xi32>
    %7 = vector.shape_cast %1 : vector<16x1xi32> to vector<16x1xi32>
    %8 = vector.broadcast %7 : vector<16x1xi32> to vector<16x128xi32>
    %9 = arith.select %3, %6, %8 : vector<16x128xi1>, vector<16x128xi32>
    %c0_2 = arith.constant 0 : index
    %c0_3 = arith.constant 0 : index
    %10 = vector.load %arg2[%c0_2, %c0_3] : memref<7x128xf32, #tpu.memory_space<vmem>>, vector<7x128xf32>
    %11 = vector.extract_strided_slice %10 {offsets = [6, 0], sizes = [1, 128], strides = [1, 1]} : vector<7x128xf32> to vector<1x128xf32>
    %12 = vector.shape_cast %11 : vector<1x128xf32> to vector<1x128xf32>
    %13 = vector.broadcast %12 : vector<1x128xf32> to vector<16x128xf32>
    %c0_i32 = arith.constant 0 : i32
    %14 = vector.broadcast %c0_i32 : i32 to vector<16x128xi32>
    %15 = arith.cmpi eq, %9, %14 : vector<16x128xi32>
    %16 = vector.extract_strided_slice %10 {offsets = [0, 0], sizes = [1, 128], strides = [1, 1]} : vector<7x128xf32> to vector<1x128xf32>
    %17 = vector.shape_cast %16 : vector<1x128xf32> to vector<1x128xf32>
    %18 = vector.broadcast %17 : vector<1x128xf32> to vector<16x128xf32>
    %19 = arith.select %15, %18, %13 : vector<16x128xi1>, vector<16x128xf32>
    %c1_i32 = arith.constant 1 : i32
    %20 = vector.broadcast %c1_i32 : i32 to vector<16x128xi32>
    %21 = arith.cmpi eq, %9, %20 : vector<16x128xi32>
    %22 = vector.extract_strided_slice %10 {offsets = [1, 0], sizes = [1, 128], strides = [1, 1]} : vector<7x128xf32> to vector<1x128xf32>
    %23 = vector.shape_cast %22 : vector<1x128xf32> to vector<1x128xf32>
    %24 = vector.broadcast %23 : vector<1x128xf32> to vector<16x128xf32>
    %25 = arith.select %21, %24, %19 : vector<16x128xi1>, vector<16x128xf32>
    %c2_i32 = arith.constant 2 : i32
    %26 = vector.broadcast %c2_i32 : i32 to vector<16x128xi32>
    %27 = arith.cmpi eq, %9, %26 : vector<16x128xi32>
    %28 = vector.extract_strided_slice %10 {offsets = [2, 0], sizes = [1, 128], strides = [1, 1]} : vector<7x128xf32> to vector<1x128xf32>
    %29 = vector.shape_cast %28 : vector<1x128xf32> to vector<1x128xf32>
    %30 = vector.broadcast %29 : vector<1x128xf32> to vector<16x128xf32>
    %31 = arith.select %27, %30, %25 : vector<16x128xi1>, vector<16x128xf32>
    %c3_i32 = arith.constant 3 : i32
    %32 = vector.broadcast %c3_i32 : i32 to vector<16x128xi32>
    %33 = arith.cmpi eq, %9, %32 : vector<16x128xi32>
    %34 = vector.extract_strided_slice %10 {offsets = [3, 0], sizes = [1, 128], strides = [1, 1]} : vector<7x128xf32> to vector<1x128xf32>
    %35 = vector.shape_cast %34 : vector<1x128xf32> to vector<1x128xf32>
    %36 = vector.broadcast %35 : vector<1x128xf32> to vector<16x128xf32>
    %37 = arith.select %33, %36, %31 : vector<16x128xi1>, vector<16x128xf32>
    %c4_i32 = arith.constant 4 : i32
    %38 = vector.broadcast %c4_i32 : i32 to vector<16x128xi32>
    %39 = arith.cmpi eq, %9, %38 : vector<16x128xi32>
    %40 = vector.extract_strided_slice %10 {offsets = [4, 0], sizes = [1, 128], strides = [1, 1]} : vector<7x128xf32> to vector<1x128xf32>
    %41 = vector.shape_cast %40 : vector<1x128xf32> to vector<1x128xf32>
    %42 = vector.broadcast %41 : vector<1x128xf32> to vector<16x128xf32>
    %43 = arith.select %39, %42, %37 : vector<16x128xi1>, vector<16x128xf32>
    %c5_i32 = arith.constant 5 : i32
    %44 = vector.broadcast %c5_i32 : i32 to vector<16x128xi32>
    %45 = arith.cmpi eq, %9, %44 : vector<16x128xi32>
    %46 = vector.extract_strided_slice %10 {offsets = [5, 0], sizes = [1, 128], strides = [1, 1]} : vector<7x128xf32> to vector<1x128xf32>
    %47 = vector.shape_cast %46 : vector<1x128xf32> to vector<1x128xf32>
    %48 = vector.broadcast %47 : vector<1x128xf32> to vector<16x128xf32>
    %49 = arith.select %45, %48, %43 : vector<16x128xi1>, vector<16x128xf32>
    %c0_4 = arith.constant 0 : index
    %c0_5 = arith.constant 0 : index
    %50 = vector.load %arg3[%c0_4, %c0_5] : memref<16x128xf32, #tpu.memory_space<vmem>>, vector<16x128xf32>
    tpu.vector_store %arg3[%c0_4, %c0_5], %49 {strides = array<i32>} : memref<16x128xf32, #tpu.memory_space<vmem>>, vector<16x128xf32>,
    return
  }
  func.func @transform_0(%arg0: i32) -> (i32, i32) {
    %c0_i32 = arith.constant 0 : i32
    %c0_i32_0 = arith.constant 0 : i32
    return %arg0, %c0_i32 : i32, i32
  }
  func.func @transform_1(%arg0: i32) -> (i32, i32) {
    %c0_i32 = arith.constant 0 : i32
    %c0_i32_0 = arith.constant 0 : i32
    %c0_i32_1 = arith.constant 0 : i32
    return %c0_i32, %c0_i32_0 : i32, i32
  }
  func.func @transform_2(%arg0: i32) -> (i32, i32) {
    %c0_i32 = arith.constant 0 : i32
    %c0_i32_0 = arith.constant 0 : i32
    return %arg0, %c0_i32 : i32, i32
  }
}

</mosaic_0001>

<bundles_post_ra>
// kernel: tile.9
= control target key start
LH: loop header
LB: loop body
LE: loop exit
PB: predicated region body
PF: predicated region fallthrough
CT: control target
= control target key end

     0   :  { %vm37_vm0 = vcmask 1046532   ;;  %vm39_vm1 = vcmask 523264   ;;  %vm49_vm2 = vcmask 1048064   ;;  %s101_s0 = inlined_call_operand.vmem [shape: f32[7,2,64], index: 0, kind: input, shape index: {}]   ;;  %s102_s1 = inlined_call_operand.vmem [shape: f32[7,128], index: 1, kind: output, shape index: {}]  }
   0x1   :  { %v56_v0 = vld [vmem:[%s101_s0 + $0xc] sm:$0x3]  ;;  %v57_v1 = vld [vmem:[%s101_s0 + $0xa] sm:$0x3]  ;;  %v58_v2 = vld [vmem:[%s101_s0 + $0x8] sm:$0x3] }
   0x2   :  { %8 = vst [vmem:[#allocation0 + $0x30] sm:$0x3] %v56_v0  ;;  %13 = vst [vmem:[#allocation0 + $0x28] sm:$0x3] %v57_v1  ;;  %v59_v3 = vld [vmem:[%s101_s0 + $0x6] sm:$0x3] }
   0x3   :  { %18 = vst [vmem:[#allocation0 + $0x20] sm:$0x3] %v58_v2  ;;  %v60_v4 = vld [vmem:[%s101_s0 + $0x4] sm:$0x3]  ;;  %v61_v5 = vld [vmem:[%s101_s0 + $0x2] sm:$0x3] }
   0x4   :  { %23 = vst [vmem:[#allocation0 + $0x18] sm:$0x3] %v59_v3  ;;  %28 = vst [vmem:[#allocation0 + $0x10] sm:$0x3] %v60_v4  ;;  %v33_v6 = vld [vmem:[%s101_s0] sm:$0x3] }
   0x5   :  { %32 = vst [vmem:[#allocation0 + $0x8] sm:$0x3] %v61_v5  ;;  %34 = vst [vmem:[#allocation0] sm:$0x3] %v33_v6  ;;  %s63_s0 = smov 64  }
   0xa   :  { %v36_v7 = vld [vmem:[#allocation0] ss:$8 sm:$0x70]   ;;  %v44_v8 = vld [vmem:[#allocation0 + $0x1] ss:$8 sm:$0x70]  }
   0xc   :  { %v35_v9 = vld [vmem:[#allocation0] ss:$8 sm:$0xf]   ;;  %v42_v10 = vld [vmem:[#allocation0 + $0x1] ss:$8 sm:$0xf]  }
   0xd   :  { %v38_v11 = vsel %vm37_vm0, %v36_v7, %v35_v9  ;;  %v46_v12 = vsel %vm37_vm0, %v44_v8, %v42_v10 }
   0xe   :  { %47 = vrot.lane.b32.xlu0 %v46_v12, %s63_s0  ;;  %40 = vst.msk [vmem:[%s102_s1] sm:$0x7f] %vm39_vm1, %v38_v11  }
  0x80   :  { %v48_v13 = vpop.permute.xlu0 %47  }
  0x81   :  { %50 = vst.msk [vmem:[%s102_s1] sm:$0x7f] %vm49_vm2, %v48_v13  }

// kernel: piece_embedding_bow.1
= control target key start
LH: loop header
LB: loop body
LE: loop exit
PB: predicated region body
PF: predicated region fallthrough
CT: control target
= control target key end

     0   :  { %v94_v0 = vmov 0   ;;  %v95_v1 = vmov 1   ;;  %v11_v4 = vlaneseq  ;;  %s128_s0 = inlined_call_operand.vmem [shape: s32[16,2], index: 0, kind: input, shape index: {}]   ;;  %s129_s1 = inlined_call_operand.vmem [shape: f32[7,128], index: 1, kind: input, shape index: {}]   ;;  %s130_s2 = inlined_call_operand.vmem [shape: f32[16,128], index: 2, kind: output, shape index: {}]  }
   0x1   :  { %92 = vset.pattern.permute.xlu1 %v94_v0  ;;  %91 = vset.pattern.permute.xlu0 %v95_v1  ;;  %v13_v2 = vld [vmem:[%s128_s0] sm:$0xff]  ;;  %v14_v3 = vld [vmem:[%s128_s0 + $0x8] sm:$0xff] }
   0x2   :  { %23 = vperm.xlu1 %92, %v13_v2   ;;  %17 = vperm.xlu0 %91, %v13_v2   ;;  %v32_v5 = vshrl.u32 %v11_v4, 7  ;;  %v12_v6 = vand.u32 127, %v11_v4  ;;  %v30_v9 = vld [vmem:[%s129_s1] sm:$0x7f] }
   0x4   :  { %v33_v7 = vsub.s32 6, %v32_v5  ;;  %v39_v8 = vsub.s32 0, %v32_v5  ;;  %v47_v10 = vsub.s32 1, %v32_v5  ;;  %v55_v11 = vsub.s32 2, %v32_v5 }
   0x5   :  { %vm15_vm0 = vcmp.ge.s32.totalorder %v12_v6, 64  ;;  %v63_v12 = vsub.s32 3, %v32_v5  ;;  %v71_v15 = vsub.s32 4, %v32_v5  ;;  %v79_v18 = vsub.s32 5, %v32_v5 }
   0x6   :  { %26 = vperm.xlu1 %92, %v14_v3   ;;  %20 = vperm.xlu0 %91, %v14_v3   ;;  %v34_v13 = vrot.slane %v30_v9, %v33_v7  ;;  %v40_v14 = vrot.slane %v30_v9, %v39_v8  ;;  %v48_v17 = vrot.slane %v30_v9, %v47_v10 }
   0x7   :  { %v56_v20 = vrot.slane %v30_v9, %v55_v11  ;;  %v64_v22 = vrot.slane %v30_v9, %v63_v12  ;;  %v72_v23 = vrot.slane %v30_v9, %v71_v15  ;;  %v80_v25 = vrot.slane %v30_v9, %v79_v18 }
   0xa   :  { %93 = vset.pattern.permute.xlu0 %v94_v0 }
  0x81   :  { %v24_v16 = vpop.permute.xlu1 %23  ;;  %v18_v19 = vpop.permute.xlu0 %17 }
  0x82   :  { %v28_v21 = vsel %vm15_vm0, %v18_v19, %v24_v16 }
  0x83   :  { %vm35_vm1 = vcmp.eq.s32.totalorder %v28_v21, 0  ;;  %vm43_vm2 = vcmp.eq.s32.totalorder %v28_v21, 1  ;;  %vm51_vm3 = vcmp.eq.s32.totalorder %v28_v21, 2  ;;  %vm59_vm4 = vcmp.eq.s32.totalorder %v28_v21, 3 }
  0x84   :  { %v41_v24 = vsel %vm35_vm1, %v40_v14, %v34_v13  ;;  %vm67_vm5 = vcmp.eq.s32.totalorder %v28_v21, 4  ;;  %vm75_vm8 = vcmp.eq.s32.totalorder %v28_v21, 5 }
  0x85   :  { %v49_v26 = vsel %vm43_vm2, %v48_v17, %v41_v24  ;;  %v27_v27 = vpop.permute.xlu1 %26  ;;  %v21_v28 = vpop.permute.xlu0 %20 }
  0x86   :  { %v57_v29 = vsel %vm51_vm3, %v56_v20, %v49_v26  ;;  %v29_v30 = vsel %vm15_vm0, %v21_v28, %v27_v27 }
  0x87   :  { %v65_v31 = vsel %vm59_vm4, %v64_v22, %v57_v29  ;;  %vm36_vm6 = vcmp.eq.s32.totalorder %v29_v30, 0  ;;  %vm44_vm7 = vcmp.eq.s32.totalorder %v29_v30, 1  ;;  %vm52_vm9 = vcmp.eq.s32.totalorder %v29_v30, 2 }
  0x88   :  { %v73_v32 = vsel %vm67_vm5, %v72_v23, %v65_v31  ;;  %v42_v33 = vsel %vm36_vm6, %v40_v14, %v34_v13  ;;  %vm60_vm10 = vcmp.eq.s32.totalorder %v29_v30, 3  ;;  %vm68_vm11 = vcmp.eq.s32.totalorder %v29_v30, 4 }
  0x89   :  { %v81_v34 = vsel %vm75_vm8, %v80_v25, %v73_v32  ;;  %v50_v35 = vsel %vm44_vm7, %v48_v17, %v42_v33  ;;  %vm76_vm12 = vcmp.eq.s32.totalorder %v29_v30, 5 }
  0x8a   :  { %83 = vst [vmem:[%s130_s2] sm:$0xff] %v81_v34  ;;  %v58_v36 = vsel %vm52_vm9, %v56_v20, %v50_v35 }
  0x8b   :  { %v66_v37 = vsel %vm60_vm10, %v64_v22, %v58_v36 }
  0x8c   :  { %v74_v38 = vsel %vm68_vm11, %v72_v23, %v66_v37 }
  0x8d   :  { %v82_v39 = vsel %vm76_vm12, %v80_v25, %v74_v38 }
  0x8e   :  { %84 = vst [vmem:[%s130_s2 + $0x8] sm:$0xff] %v82_v39 }

</bundles_post_ra>
